<compile_context>
chip_gen: v7x
topology: tpu7x:2x2x1
jax: 0.10.0
libtpu: 0.0.40
codegen_flags: <defaults>
</compile_context>

<pallas_src>
import functools

import jax
import jax.numpy as jnp
from jax.experimental import pallas as pl
from jax.experimental.pallas import tpu as pltpu

# dict_update indices (synthetic config): 'update' -> 1, 'inherit' -> 0
UPDATE_IDX = 1
INHERIT_IDX = 0

_LANE = 128

# Generation-aware VMEM numbers, queried once at import time.  Fallback is the
# most conservative (v7x: 64 MiB physical VMEM).
try:
    _VMEM_PHYS = int(pltpu.get_tpu_info().vmem_capacity_bytes)
except Exception:  # pragma: no cover - query unavailable -> assume v7x
    _VMEM_PHYS = 64 * 1024 * 1024
# Scoped limit handed to Mosaic: 48 MiB on v7x (64 MiB phys), 96 MiB on
# v5e / v6e (128 MiB phys).
_VMEM_LIMIT = int(min((_VMEM_PHYS * 3) // 4, 96 * 1024 * 1024))
# Budget used when sizing the double-buffered pipeline (leave headroom for
# compiler scratch / spills).
_VMEM_BUDGET = _VMEM_LIMIT // 2
# Target HBM bytes fetched per grid step (~4 MiB tiles -> >=85% of roofline,
# per-grid-step overhead ~0.35 us becomes negligible).
_TARGET_TILE_BYTES = 4 * 1024 * 1024


def _selector_kernel(x_ref, dw_ref, db_ref, p_ref):
    """One row-tile of the preliminary selector.

    x_ref:  (TM, H) row tile of the flattened hidden states (native dtype)
    dw_ref: (1, H)  lane-dense f32 weight delta  w[:, UPDATE] - w[:, INHERIT]
    db_ref: (1, 1)  f32 bias delta in SMEM       b[UPDATE]   - b[INHERIT]
    p_ref:  (TM, 1) f32 P(update) = sigmoid(x . dw + db)
    """
    # VPU multiply + lane reduce (keeps the MXU out of the picture; see header).
    x = x_ref[...].astype(jnp.float32)          # f32 accumulation / precision
    y = x * dw_ref[...]                         # (1, H) broadcast over rows
    d = jnp.sum(y, axis=-1, keepdims=True) + db_ref[0, 0]
    # 2-class softmax == sigmoid of the logit difference (exact rewrite).
    p_ref[...] = 1.0 / (1.0 + jnp.exp(-d))      # exp on the EUP


@functools.partial(jax.jit, static_argnames=("max_rows",))
def preliminary_selector(x, w, b, *, max_rows=4096):
    """x: [B, S, H]; w: [H, 2] (torch fc.weight transposed); b: [2]
    -> (prob_update [B, S, 2], pre_score [B, S])."""
    B, S, H = x.shape
    N = B * S
    x2 = x.reshape(N, H)
    itemsize = jnp.dtype(x.dtype).itemsize
    h_pad = pl.cdiv(H, _LANE) * _LANE           # lane-padded tile width in VMEM

    # --- row-tile selection (byte-targeted, VMEM-budget-capped) --------------
    # Per-row VMEM with double buffering: x tile (2 bufs) + lane-padded (TM, 1)
    # f32 output (2 bufs).  The lane-dense (1, H) dw block is a fixed
    # ~2*8*h_pad*4 bytes (sublane-padded), accounted separately.
    per_row = 2 * h_pad * itemsize + 2 * _LANE * 4
    dw_bytes = 2 * 8 * h_pad * 4
    budget_rows = max(8, (_VMEM_BUDGET - dw_bytes) // per_row)
    target_rows = max(8, _TARGET_TILE_BYTES // (h_pad * itemsize))
    tm = min(max_rows, target_rows, budget_rows)
    if tm >= _LANE:
        tm = tm // _LANE * _LANE                # multiple of 128: covers bf16/int8
    else:                                       # sublane packing and lane alignment
        tm = max(8, tm // 8 * 8)

    if N > _LANE:
        # Guarantee >=2 grid steps so dimension_semantics=("parallel",) can
        # actually feed both TensorCores on v7x (megacore).
        half = ((pl.cdiv(N, 2) + _LANE - 1) // _LANE) * _LANE
        tm = min(tm, half)
    if tm >= N:
        tm = N                                  # single full block (always legal)
    grid = (pl.cdiv(N, tm),)                    # ragged last block masked by Pallas

    # --- prepack the tiny deltas ---------------------------------------------
    # Lane-dense (1, H) f32 weight delta; f32 keeps full precision for bf16 x.
    dw = (w[:, UPDATE_IDX] - w[:, INHERIT_IDX]).astype(jnp.float32).reshape(1, H)
    db = (b[UPDATE_IDX] - b[INHERIT_IDX]).astype(jnp.float32).reshape(1, 1)

    bytes_accessed = N * H * itemsize + N * 4 + H * 4 + 4

    p_flat = pl.pallas_call(
        _selector_kernel,
        out_shape=jax.ShapeDtypeStruct((N, 1), jnp.float32),
        grid_spec=pltpu.PrefetchScalarGridSpec(
            num_scalar_prefetch=0,
            grid=grid,
            in_specs=[
                pl.BlockSpec((tm, H), lambda i: (i, 0)),            # x row tile
                pl.BlockSpec((1, H), lambda i: (0, 0)),             # weight delta
                pl.BlockSpec(memory_space=pltpu.MemorySpace.SMEM),  # bias delta
            ],
            out_specs=pl.BlockSpec((tm, 1), lambda i: (i, 0)),
        ),
        compiler_params=pltpu.CompilerParams(
            dimension_semantics=("parallel",),     # shard row tiles over TCs
            vmem_limit_bytes=_VMEM_LIMIT,
        ),
        cost_estimate=pl.CostEstimate(
            flops=2 * N * H,
            transcendentals=N,
            bytes_accessed=int(bytes_accessed),
        ),
    )(x2, dw, db)

    # Tiny epilogue on the (N,) probabilities (fused by XLA with the reshape).
    p_up = p_flat.reshape(B, S)
    p_in = 1.0 - p_up
    cols = [None, None]
    cols[UPDATE_IDX] = p_up
    cols[INHERIT_IDX] = p_in
    prob = jnp.stack(cols, axis=-1).astype(x.dtype)     # [B, S, 2]
    score = (p_up - p_in).astype(x.dtype)               # [B, S]
    return prob, score


def _reference(x, w, b):
    logits = jnp.einsum("bsh,ho->bso", x, w) + b
    prob = jax.nn.softmax(logits, axis=-1)
    score = prob[:, :, UPDATE_IDX] - prob[:, :, INHERIT_IDX]
    return prob, score


if __name__ == "__main__":
    # Small shapes consistent with the module: batch=2, slotType=4, hidden=32.
    B, S, H = 2, 4, 32
    key = jax.random.PRNGKey(0)
    kx, kw, kb = jax.random.split(key, 3)

    x = jax.random.normal(kx, (B, S, H), dtype=jnp.float32)
    # nn.Linear(hidden_size, 2): torch weight [2, H], bias [2]; stored as [H, 2].
    w = jax.random.normal(kw, (H, 2), dtype=jnp.float32) * 0.1
    b = jax.random.normal(kb, (2,), dtype=jnp.float32) * 0.1

    prob, score = preliminary_selector(x, w, b)
    jax.block_until_ready((prob, score))

    prob_ref, score_ref = _reference(x, w, b)
    assert prob.shape == (B, S, 2) and score.shape == (B, S)
    assert jnp.allclose(prob, prob_ref, atol=1e-5, rtol=1e-5)
    assert jnp.allclose(score, score_ref, atol=1e-5, rtol=1e-5)

    print("KERNEL_OK")
</pallas_src>

<mosaic_0001>
module attributes {stable_mosaic.version = 11 : i64} {
  func.func @_selector_kernel(%arg0: i32, %arg1: memref<8x32xf32, #tpu.memory_space<vmem>>, %arg2: memref<1x32xf32, #tpu.memory_space<vmem>>, %arg3: memref<1x1xf32, #tpu.memory_space<smem>>, %arg4: memref<8x1xf32, #tpu.memory_space<vmem>>) attributes {dimension_semantics = [#tpu.dimension_semantics<parallel>], iteration_bounds = array<i64: 1>, scalar_prefetch = 0 : i64, scratch_operands = 0 : i64, tpu.core_type = #tpu.core_type<tc>, window_params = [{transform_indices = @transform_0, window_bounds = array<i64: 8, 32>}, {pipeline_mode = #tpu.pipeline_mode<synchronous>, transform_indices = @transform_1, window_bounds = array<i64: 1, 32>}, {transform_indices = @transform_2, window_bounds = array<i64: 1, 1>}, {transform_indices = @transform_3, window_bounds = array<i64: 8, 1>}]} {
    %c0 = arith.constant 0 : index
    %c0_0 = arith.constant 0 : index
    %0 = vector.load %arg1[%c0, %c0_0] : memref<8x32xf32, #tpu.memory_space<vmem>>, vector<8x32xf32>
    %c0_1 = arith.constant 0 : index
    %c0_2 = arith.constant 0 : index
    %1 = vector.load %arg2[%c0_1, %c0_2] : memref<1x32xf32, #tpu.memory_space<vmem>>, vector<1x32xf32>
    %2 = vector.broadcast %1 : vector<1x32xf32> to vector<8x32xf32>
    %3 = arith.mulf %0, %2 : vector<8x32xf32>
    %cst = arith.constant dense<0.000000e+00> : vector<8xf32>
    %4 = vector.multi_reduction <add>, %3, %cst [1] : vector<8x32xf32> to vector<8xf32>
    %5 = vector.shape_cast %4 : vector<8xf32> to vector<8x1xf32>
    %c0_3 = arith.constant 0 : index
    %c0_4 = arith.constant 0 : index
    %6 = memref.load %arg3[%c0_3, %c0_4] : memref<1x1xf32, #tpu.memory_space<smem>>
    %7 = vector.broadcast %6 : f32 to vector<8x1xf32>
    %8 = arith.addf %5, %7 : vector<8x1xf32>
    %cst_5 = arith.constant 0.000000e+00 : f32
    %9 = vector.broadcast %cst_5 : f32 to vector<8x1xf32>
    %10 = arith.subf %9, %8 : vector<8x1xf32>
    %11 = math.exp %10 : vector<8x1xf32>
    %cst_6 = arith.constant 1.000000e+00 : f32
    %12 = vector.broadcast %cst_6 : f32 to vector<8x1xf32>
    %13 = arith.addf %12, %11 : vector<8x1xf32>
    %cst_7 = arith.constant 1.000000e+00 : f32
    %14 = vector.broadcast %cst_7 : f32 to vector<8x1xf32>
    %15 = arith.divf %14, %13 : vector<8x1xf32>
    %c0_8 = arith.constant 0 : index
    %c0_9 = arith.constant 0 : index
    %16 = vector.load %arg4[%c0_8, %c0_9] : memref<8x1xf32, #tpu.memory_space<vmem>>, vector<8x1xf32>
    tpu.vector_store %arg4[%c0_8, %c0_9], %15 {strides = array<i32>} : memref<8x1xf32, #tpu.memory_space<vmem>>, vector<8x1xf32>,
    return
  }
  func.func @transform_0(%arg0: i32) -> (i32, i32) {
    %c0_i32 = arith.constant 0 : i32
    %c0_i32_0 = arith.constant 0 : i32
    return %arg0, %c0_i32 : i32, i32
  }
  func.func @transform_1(%arg0: i32) -> (i32, i32) {
    %c0_i32 = arith.constant 0 : i32
    %c0_i32_0 = arith.constant 0 : i32
    %c0_i32_1 = arith.constant 0 : i32
    return %c0_i32, %c0_i32_0 : i32, i32
  }
  func.func @transform_2(%arg0: i32) -> (i32, i32) {
    %c0_i32 = arith.constant 0 : i32
    %c0_i32_0 = arith.constant 0 : i32
    %c0_i32_1 = arith.constant 0 : i32
    return %c0_i32, %c0_i32_0 : i32, i32
  }
  func.func @transform_3(%arg0: i32) -> (i32, i32) {
    %c0_i32 = arith.constant 0 : i32
    %c0_i32_0 = arith.constant 0 : i32
    return %arg0, %c0_i32 : i32, i32
  }
}

</mosaic_0001>

<bundles_post_ra>
// kernel: preliminary_selector.1
= control target key start
LH: loop header
LB: loop body
LE: loop exit
PB: predicated region body
PF: predicated region fallthrough
CT: control target
= control target key end

     0   :  { %vm24_vm0 = vcmask 261120   ;;  %vm37_vm1 = vcmask 7168   ;;  %s80_s0 = inlined_call_operand.vmem [shape: f32[8,32], index: 0, kind: input, shape index: {}]   ;;  %s81_s1 = inlined_call_operand.vmem [shape: f32[1,32], index: 1, kind: input, shape index: {}]   ;;  %s82_s2 = inlined_call_operand.<no memory space> [shape: f32[1,1], index: 2, kind: input, shape index: {}]   ;;  %s83_s3 = inlined_call_operand.vmem [shape: f32[8,1], index: 3, kind: output, shape index: {}]  }
   0x1   :  { %v15_v0 = vld [vmem:[%s80_s0] sm:$0xff]  ;;  %v29_v4 = vstv %s82_s2 }
   0x2   :  { %v43_v1 = vld [vmem:[%s81_s1] ss:$0 sm:$0xff] }
   0x3   :  { %v23_v2 = vmul.f32 %v43_v1, %v15_v0 }
   0x5   :  { %v25_v3 = vsel %vm24_vm0, %v23_v2, 0.0 }
   0x6   :  { %26 = vadd.xlane.f32.xlu0 %v25_v3 }
  0x93   :  { %v27_v5 = vpop.xlane.xlu0 %26 }
  0x94   :  { %v30_v6 = vadd.f32 %v29_v4, %v27_v5 }
  0x96   :  { %v31_v7 = vsub.f32 0.0, %v30_v6 }
  0x98   :  { %v32_v8 = vmul.f32 1.442695, %v31_v7 }
  0x9a   :  { %44 = vpow2.f32 %v32_v8 }
  0xa4   :  { %v45_v9 = vpop.eup %44 }
  0xa5   :  { %v34_v10 = vadd.f32 1.0, %v45_v9 }
  0xa7   :  { %46 = vrcp.f32 %v34_v10 }
  0xb1   :  { %v47_v11 = vpop.eup %46 }
  0xb2   :  { %38 = vst.msk [vmem:[%s83_s3] sm:$0xff] %vm37_vm1, %v47_v11 }

</bundles_post_ra>
